<compile_context>
chip_gen: v7x
topology: tpu7x:2x2x1
jax: 0.10.0
libtpu: 0.0.40
codegen_flags: <defaults>
</compile_context>

<pallas_src>
import functools

import jax
import jax.numpy as jnp
from jax import lax
from jax.experimental import pallas as pl
from jax.experimental.pallas import tpu as pltpu

_BN_EPS = 1e-5


def _linear_bn_kernel(x_ref, w_ref, b_ref, g_ref, be_ref, o_ref, acc_ref, *, relu):
    """One (B, tk) x (tk, tn) MXU step; BN + ReLU applied on the last K step."""
    k = pl.program_id(1)

    @pl.when(k == 0)
    def _init():
        acc_ref[...] = jnp.zeros_like(acc_ref)

    # bf16 operands on the MXU, f32 accumulation.
    acc_ref[...] += jnp.dot(
        x_ref[...].astype(jnp.bfloat16),
        w_ref[...].astype(jnp.bfloat16),
        preferred_element_type=jnp.float32,
    )

    @pl.when(k == pl.num_programs(1) - 1)
    def _finalize():
        z = acc_ref[...] + b_ref[...]                                   # f32
        mu = jnp.mean(z, axis=0, keepdims=True)                         # full-batch stats
        var = jnp.mean((z - mu) * (z - mu), axis=0, keepdims=True)      # biased variance
        y = (z - mu) * lax.rsqrt(var + _BN_EPS) * g_ref[...] + be_ref[...]
        if relu:
            y = jnp.maximum(y, 0.0)
        o_ref[...] = y.astype(o_ref.dtype)


def _linear_bn_layer(x, w, b, g, be, *, relu, out_dtype, tn=512, tk=512):
    """Linear + BatchNorm1d(+ReLU) tiled over (output features, contraction)."""
    B, K = x.shape
    Kw, N = w.shape
    assert K == Kw, "weight/input contraction mismatch"
    tk = min(tk, K)
    tn = min(tn, N)
    if (K % tk) or (N % tn):
        raise ValueError("feature dims must be divisible by the tile sizes")

    grid = (N // tn, K // tk)

    x_bytes = jnp.dtype(x.dtype).itemsize
    w_bytes = jnp.dtype(w.dtype).itemsize
    o_bytes = jnp.dtype(out_dtype).itemsize
    # Double-buffered inputs/outputs + f32 accumulator, plus headroom.
    tile_footprint = (
        2 * (B * tk * x_bytes + tk * tn * w_bytes + 3 * tn * 4 + B * tn * o_bytes)
        + B * tn * 4
    )
    vmem_limit = min(int(tile_footprint * 1.5) + (4 << 20), 48 << 20)

    cost = pl.CostEstimate(
        flops=2 * B * K * N,
        transcendentals=N,
        bytes_accessed=B * K * x_bytes + K * N * w_bytes + 3 * N * 4 + B * N * o_bytes,
    )

    return pl.pallas_call(
        functools.partial(_linear_bn_kernel, relu=relu),
        out_shape=jax.ShapeDtypeStruct((B, N), out_dtype),
        grid_spec=pltpu.PrefetchScalarGridSpec(
            num_scalar_prefetch=0,
            grid=grid,
            in_specs=[
                pl.BlockSpec((B, tk), lambda j, k: (0, k)),    # activations (full batch)
                pl.BlockSpec((tk, tn), lambda j, k: (k, j)),   # weight tile
                pl.BlockSpec((1, tn), lambda j, k: (0, j)),    # bias
                pl.BlockSpec((1, tn), lambda j, k: (0, j)),    # BN gamma
                pl.BlockSpec((1, tn), lambda j, k: (0, j)),    # BN beta
            ],
            out_specs=pl.BlockSpec((B, tn), lambda j, k: (0, j)),
            scratch_shapes=[pltpu.VMEM((B, tn), jnp.float32)],
        ),
        compiler_params=pltpu.CompilerParams(
            dimension_semantics=("parallel", "arbitrary"),
            vmem_limit_bytes=vmem_limit,
        ),
        cost_estimate=cost,
    )(x, w, b, g, be)


def projection_mlp_forward(x, params, num_layers=3, *, tn=512, tk=512):
    """x: (B, in_dim). params: dict w1,b1,g1,be1,w2,b2,g2,be2,w3,b3,g3,be3."""
    if num_layers not in (2, 3):
        raise Exception("num_layers must be 2 or 3")
    out_dtype = x.dtype
    # Hidden activations stored bf16 (halves inter-layer HBM traffic; BN/acc in f32).
    h = _linear_bn_layer(x, params["w1"], params["b1"], params["g1"], params["be1"],
                         relu=True, out_dtype=jnp.bfloat16, tn=tn, tk=tk)
    if num_layers == 3:
        h = _linear_bn_layer(h, params["w2"], params["b2"], params["g2"], params["be2"],
                             relu=True, out_dtype=jnp.bfloat16, tn=tn, tk=tk)
    # num_layers == 2: layer2 skipped, exactly like the PyTorch forward()
    return _linear_bn_layer(h, params["w3"], params["b3"], params["g3"], params["be3"],
                            relu=False, out_dtype=out_dtype, tn=tn, tk=tk)


def init_params(key, in_dim, hidden_dim, out_dim):
    """Deterministic synthetic init (shapes match the nn.Module), f32."""
    ks = jax.random.split(key, 6)

    def lin(kw, kb, fan_in, fan_out):
        bound = 1.0 / (fan_in ** 0.5)
        w = jax.random.uniform(kw, (fan_in, fan_out), jnp.float32, -bound, bound)
        b = jax.random.uniform(kb, (1, fan_out), jnp.float32, -bound, bound)
        return w, b

    w1, b1 = lin(ks[0], ks[1], in_dim, hidden_dim)
    w2, b2 = lin(ks[2], ks[3], hidden_dim, hidden_dim)
    w3, b3 = lin(ks[4], ks[5], hidden_dim, out_dim)
    return dict(
        w1=w1, b1=b1, g1=jnp.ones((1, hidden_dim), jnp.float32),
        be1=jnp.zeros((1, hidden_dim), jnp.float32),
        w2=w2, b2=b2, g2=jnp.ones((1, hidden_dim), jnp.float32),
        be2=jnp.zeros((1, hidden_dim), jnp.float32),
        w3=w3, b3=b3, g3=jnp.ones((1, out_dim), jnp.float32),
        be3=jnp.zeros((1, out_dim), jnp.float32),
    )


def prepare_params(params):
    """Store Linear weights in bf16 once (HBM-bandwidth win; matmul still accumulates f32)."""
    out = dict(params)
    for k in ("w1", "w2", "w3"):
        out[k] = params[k].astype(jnp.bfloat16)
    return out


def reference_forward(x, p, num_layers=3):
    """Pure-JAX reference with the same precision policy as the kernel."""
    def blk(h, w, b, g, be, relu, out_dtype):
        z = jnp.dot(h.astype(jnp.bfloat16), w.astype(jnp.bfloat16),
                    preferred_element_type=jnp.float32) + b
        mu = z.mean(0, keepdims=True)
        var = ((z - mu) ** 2).mean(0, keepdims=True)
        y = (z - mu) / jnp.sqrt(var + _BN_EPS) * g + be
        if relu:
            y = jnp.maximum(y, 0.0)
        return y.astype(out_dtype)

    h = blk(x, p["w1"], p["b1"], p["g1"], p["be1"], True, jnp.bfloat16)
    if num_layers == 3:
        h = blk(h, p["w2"], p["b2"], p["g2"], p["be2"], True, jnp.bfloat16)
    return blk(h, p["w3"], p["b3"], p["g3"], p["be3"], False, jnp.float32)


if __name__ == "__main__":
    key = jax.random.PRNGKey(0)
    kx, kp = jax.random.split(key)

    # Small but TPU-friendly shapes: batch on the sublane axis, all feature
    # dims multiples of 128 so every block is lane-dense (unmasked stores).
    B, in_dim, hidden_dim, out_dim = 16, 128, 256, 128
    x = jax.random.normal(kx, (B, in_dim), jnp.float32)
    params = prepare_params(init_params(kp, in_dim, hidden_dim, out_dim))

    # tn=tk=128 so the test exercises both the parallel-N axis and the
    # K-accumulator; production default is 512-wide tiles.
    out3 = projection_mlp_forward(x, params, num_layers=3, tn=128, tk=128)
    out2 = projection_mlp_forward(x, params, num_layers=2, tn=128, tk=128)
    jax.block_until_ready((out3, out2))

    ref3 = reference_forward(x, params, num_layers=3)
    ref2 = reference_forward(x, params, num_layers=2)

    assert out3.shape == (B, out_dim) and out2.shape == (B, out_dim)
    assert jnp.allclose(out3, ref3, atol=1e-2, rtol=1e-2)
    assert jnp.allclose(out2, ref2, atol=1e-2, rtol=1e-2)

    print("KERNEL_OK")
</pallas_src>

<mosaic_0001>
module attributes {stable_mosaic.version = 11 : i64} {
  func.func @_linear_bn_kernel(%arg0: i32, %arg1: i32, %arg2: memref<16x128xf32, #tpu.memory_space<vmem>>, %arg3: memref<128x128xbf16, #tpu.memory_space<vmem>>, %arg4: memref<1x128xf32, #tpu.memory_space<vmem>>, %arg5: memref<1x128xf32, #tpu.memory_space<vmem>>, %arg6: memref<1x128xf32, #tpu.memory_space<vmem>>, %arg7: memref<16x128xbf16, #tpu.memory_space<vmem>>, %arg8: memref<16x128xf32, #tpu.memory_space<vmem>>) attributes {dimension_semantics = [#tpu.dimension_semantics<parallel>, #tpu.dimension_semantics<arbitrary>], iteration_bounds = array<i64: 2, 1>, scalar_prefetch = 0 : i64, scratch_operands = 1 : i64, tpu.core_type = #tpu.core_type<tc>, window_params = [{transform_indices = @transform_0, window_bounds = array<i64: 16, 128>}, {transform_indices = @transform_1, window_bounds = array<i64: 128, 128>}, {transform_indices = @transform_2, window_bounds = array<i64: 1, 128>}, {transform_indices = @transform_3, window_bounds = array<i64: 1, 128>}, {transform_indices = @transform_4, window_bounds = array<i64: 1, 128>}, {transform_indices = @transform_5, window_bounds = array<i64: 16, 128>}]} {
    %c0_i32 = arith.constant 0 : i32
    %0 = arith.cmpi eq, %arg1, %c0_i32 : i32
    %1 = arith.extui %0 : i1 to i32
    %c0_i32_0 = arith.constant 0 : i32
    %2 = arith.cmpi ne, %1, %c0_i32_0 : i32
    scf.if %2 {
      %cst_10 = arith.constant 0.000000e+00 : f32
      %13 = vector.broadcast %cst_10 : f32 to vector<16x128xf32>
      %c0_11 = arith.constant 0 : index
      %c0_12 = arith.constant 0 : index
      %14 = vector.load %arg8[%c0_11, %c0_12] : memref<16x128xf32, #tpu.memory_space<vmem>>, vector<16x128xf32>
      tpu.vector_store %arg8[%c0_11, %c0_12], %13 {strides = array<i32>} : memref<16x128xf32, #tpu.memory_space<vmem>>, vector<16x128xf32>,
    } else {
    }
    %c0 = arith.constant 0 : index
    %c0_1 = arith.constant 0 : index
    %3 = vector.load %arg8[%c0, %c0_1] : memref<16x128xf32, #tpu.memory_space<vmem>>, vector<16x128xf32>
    %c0_2 = arith.constant 0 : index
    %c0_3 = arith.constant 0 : index
    %4 = vector.load %arg2[%c0_2, %c0_3] : memref<16x128xf32, #tpu.memory_space<vmem>>, vector<16x128xf32>
    %5 = arith.truncf %4 : vector<16x128xf32> to vector<16x128xbf16>
    %c0_4 = arith.constant 0 : index
    %c0_5 = arith.constant 0 : index
    %6 = vector.load %arg3[%c0_4, %c0_5] : memref<128x128xbf16, #tpu.memory_space<vmem>>, vector<128x128xbf16>
    %cst = arith.constant dense<0.000000e+00> : vector<16x128xf32>
    %7 = tpu.matmul %5, %6, %cst {dimension_numbers = #tpu.dot_dimension_numbers<[1], [0], [0], [1], [0, 0, 1, 1], [], []>} : vector<16x128xbf16>, vector<128x128xbf16>, vector<16x128xf32> -> vector<16x128xf32>
    %8 = arith.addf %3, %7 : vector<16x128xf32>
    %c0_6 = arith.constant 0 : index
    %c0_7 = arith.constant 0 : index
    %9 = vector.load %arg8[%c0_6, %c0_7] : memref<16x128xf32, #tpu.memory_space<vmem>>, vector<16x128xf32>
    tpu.vector_store %arg8[%c0_6, %c0_7], %8 {strides = array<i32>} : memref<16x128xf32, #tpu.memory_space<vmem>>, vector<16x128xf32>,
    %c0_i32_8 = arith.constant 0 : i32
    %10 = arith.cmpi eq, %arg1, %c0_i32_8 : i32
    %11 = arith.extui %10 : i1 to i32
    %c0_i32_9 = arith.constant 0 : i32
    %12 = arith.cmpi ne, %11, %c0_i32_9 : i32
    scf.if %12 {
      %c0_10 = arith.constant 0 : index
      %c0_11 = arith.constant 0 : index
      %13 = vector.load %arg8[%c0_10, %c0_11] : memref<16x128xf32, #tpu.memory_space<vmem>>, vector<16x128xf32>
      %c0_12 = arith.constant 0 : index
      %c0_13 = arith.constant 0 : index
      %14 = vector.load %arg4[%c0_12, %c0_13] : memref<1x128xf32, #tpu.memory_space<vmem>>, vector<1x128xf32>
      %15 = vector.broadcast %14 : vector<1x128xf32> to vector<16x128xf32>
      %16 = arith.addf %13, %15 : vector<16x128xf32>
      %cst_14 = arith.constant dense<0.000000e+00> : vector<128xf32>
      %17 = vector.multi_reduction <add>, %16, %cst_14 [0] : vector<16x128xf32> to vector<128xf32>
      %18 = vector.shape_cast %17 : vector<128xf32> to vector<1x128xf32>
      %cst_15 = arith.constant 1.600000e+01 : f32
      %19 = vector.broadcast %cst_15 : f32 to vector<1x128xf32>
      %20 = arith.divf %18, %19 : vector<1x128xf32>
      %21 = vector.broadcast %20 : vector<1x128xf32> to vector<16x128xf32>
      %22 = arith.subf %16, %21 : vector<16x128xf32>
      %23 = vector.broadcast %20 : vector<1x128xf32> to vector<16x128xf32>
      %24 = arith.subf %16, %23 : vector<16x128xf32>
      %25 = arith.mulf %22, %24 : vector<16x128xf32>
      %cst_16 = arith.constant dense<0.000000e+00> : vector<128xf32>
      %26 = vector.multi_reduction <add>, %25, %cst_16 [0] : vector<16x128xf32> to vector<128xf32>
      %27 = vector.shape_cast %26 : vector<128xf32> to vector<1x128xf32>
      %cst_17 = arith.constant 1.600000e+01 : f32
      %28 = vector.broadcast %cst_17 : f32 to vector<1x128xf32>
      %29 = arith.divf %27, %28 : vector<1x128xf32>
      %30 = vector.broadcast %20 : vector<1x128xf32> to vector<16x128xf32>
      %31 = arith.subf %16, %30 : vector<16x128xf32>
      %cst_18 = arith.constant 9.99999974E-6 : f32
      %32 = vector.broadcast %cst_18 : f32 to vector<1x128xf32>
      %33 = arith.addf %29, %32 : vector<1x128xf32>
      %34 = math.rsqrt %33 : vector<1x128xf32>
      %35 = vector.broadcast %34 : vector<1x128xf32> to vector<16x128xf32>
      %36 = arith.mulf %31, %35 : vector<16x128xf32>
      %c0_19 = arith.constant 0 : index
      %c0_20 = arith.constant 0 : index
      %37 = vector.load %arg5[%c0_19, %c0_20] : memref<1x128xf32, #tpu.memory_space<vmem>>, vector<1x128xf32>
      %38 = vector.broadcast %37 : vector<1x128xf32> to vector<16x128xf32>
      %39 = arith.mulf %36, %38 : vector<16x128xf32>
      %c0_21 = arith.constant 0 : index
      %c0_22 = arith.constant 0 : index
      %40 = vector.load %arg6[%c0_21, %c0_22] : memref<1x128xf32, #tpu.memory_space<vmem>>, vector<1x128xf32>
      %41 = vector.broadcast %40 : vector<1x128xf32> to vector<16x128xf32>
      %42 = arith.addf %39, %41 : vector<16x128xf32>
      %cst_23 = arith.constant 0.000000e+00 : f32
      %43 = vector.broadcast %cst_23 : f32 to vector<16x128xf32>
      %44 = arith.maximumf %42, %43 : vector<16x128xf32>
      %45 = arith.truncf %44 : vector<16x128xf32> to vector<16x128xbf16>
      %c0_24 = arith.constant 0 : index
      %c0_25 = arith.constant 0 : index
      %46 = vector.load %arg7[%c0_24, %c0_25] : memref<16x128xbf16, #tpu.memory_space<vmem>>, vector<16x128xbf16>
      tpu.vector_store %arg7[%c0_24, %c0_25], %45 {strides = array<i32>} : memref<16x128xbf16, #tpu.memory_space<vmem>>, vector<16x128xbf16>,
    } else {
    }
    return
  }
  func.func @transform_0(%arg0: i32, %arg1: i32) -> (i32, i32) {
    %c0_i32 = arith.constant 0 : i32
    %c0_i32_0 = arith.constant 0 : i32
    return %c0_i32, %arg1 : i32, i32
  }
  func.func @transform_1(%arg0: i32, %arg1: i32) -> (i32, i32) {
    %c0_i32 = arith.constant 0 : i32
    return %arg1, %arg0 : i32, i32
  }
  func.func @transform_2(%arg0: i32, %arg1: i32) -> (i32, i32) {
    %c0_i32 = arith.constant 0 : i32
    %c0_i32_0 = arith.constant 0 : i32
    return %c0_i32, %arg0 : i32, i32
  }
  func.func @transform_3(%arg0: i32, %arg1: i32) -> (i32, i32) {
    %c0_i32 = arith.constant 0 : i32
    %c0_i32_0 = arith.constant 0 : i32
    return %c0_i32, %arg0 : i32, i32
  }
  func.func @transform_4(%arg0: i32, %arg1: i32) -> (i32, i32) {
    %c0_i32 = arith.constant 0 : i32
    %c0_i32_0 = arith.constant 0 : i32
    return %c0_i32, %arg0 : i32, i32
  }
  func.func @transform_5(%arg0: i32, %arg1: i32) -> (i32, i32) {
    %c0_i32 = arith.constant 0 : i32
    %c0_i32_0 = arith.constant 0 : i32
    return %c0_i32, %arg0 : i32, i32
  }
}

</mosaic_0001>

<bundles_post_ra>
// kernel: tpu_custom_call.1
= control target key start
LH: loop header
LB: loop body
LE: loop exit
PB: predicated region body
PF: predicated region fallthrough
CT: control target
= control target key end

     0   :  { %10 = vsyncpa [#allocation4], 0  ;;  %s1235_s0 = inlined_call_operand.hbm [shape: f32[16,128], index: 0, kind: input, shape index: {}]   ;;  %s1236_s1 = inlined_call_operand.hbm [shape: bf16[128,256], index: 1, kind: input, shape index: {}]   ;;  %s1237_s2 = inlined_call_operand.vmem [shape: f32[1,256], index: 2, kind: input, shape index: {}]   ;;  %s1238_s3 = inlined_call_operand.vmem [shape: f32[1,256], index: 3, kind: input, shape index: {}]   ;;  %s1239_s4 = inlined_call_operand.vmem [shape: f32[1,256], index: 4, kind: input, shape index: {}]   ;;  %s1240_s5 = inlined_call_operand.hbm [shape: bf16[16,256], index: 5, kind: output, shape index: {}]  }
   0x1   :  { %11 = vsyncpa [#allocation7], 0 }
   0x2   :  { %13 = vsyncpa [#allocation7 + $0x1], 0 }
   0x3   :  { %14 = vsyncpa [#allocation5], 0 }
   0x4   :  { %16 = vsyncpa [#allocation5 + $0x1], 0  ;;  %s995_s18 = smov 0   ;;  %s997_s19 = smov 0  }
   0x5   :  { %s999_s20 = smov 0   ;;  %s1001_s21 = smov 0  }
   0x6   :  { %s1003_s22 = smov 0   ;;  %s1005_s23 = smov 0  }
   0x7 LB: > { %1250 = sst [smem:[#allocation12_spill]] %s951_s23  ;;  %s651_s24 = sadd.s32 4294967295, %s951_s23   ;;  %s951_s23 = sphi %s1005_s23, %s22_s23   ;;  %s947_s22 = sphi %s1003_s22, %s1272_s22   ;;  %s943_s21 = sphi %s1001_s21, %s1271_s21   ;;  %s939_s20 = sphi %s999_s20, %s1270_s20   ;;  %s935_s19 = sphi %s997_s19, %s1269_s19   ;;  %s931_s18 = sphi %s995_s18, %s1268_s18  }
   0x8   : > { %s652_s25 = sadd.s32 4294967294, %s951_s23   ;;  %p76_p0 = scmp.ne.s32.totalorder %s939_s20, %s935_s19 }
   0x9   : > { %p77_p1 = scmp.eq.s32.totalorder %s951_s23, 0  ;;  %p82_p2 = scmp.ne.s32.totalorder %s935_s19, %s931_s18 }
   0xa   : > { %p1032_p3 = scmp.eq.s32.totalorder %s651_s24, 0  ;;  %p184_p5 = scmp.eq.s32.totalorder %s651_s24, 1 }
   0xb   : > { %p1036_p4 = por %p77_p1, %p76_p0  ;;  %p190_p7 = scmp.eq.s32.totalorder %s652_s25, 1 }
   0xc   : > { %s1251_s26 = scalar_select %p1032_p3, 1, 0 }
   0xd   : > { %p1042_p6 = por %p1032_p3, %p82_p2  ;;  %p1046_p8 = por %p184_p5, %p76_p0 }
   0xe   : > { %p653_p9 = scmp.ge.s32.totalorder %s951_s23, 1  ;;  %p1051_p10 = por %p190_p7, %p82_p2 }
   0xf   : > { %s1253_s28 = scalar_select %p1042_p6, 1, 0 }
  0x10   : > { %s1254_s29 = scalar_select %p1046_p8, 1, 0 }
  0x11   : > { %s1255_s30 = scalar_select %p1051_p10, 1, 0 }
  0x12   : > { %p197_p11 = scmp.lt.s32.totalorder %s951_s23, 3  ;;  %s953_s7 = smov [#allocation3]  }
  0x13   : > { %s211_s8 = sshll.u32 %s953_s7, 4  ;;  %p736_p1 = scmp.lt.s32.totalorder %s951_s23, 2  ;;  %s1060_s8 = int_to_ptr.vmem [resolvable:$true] %s211_s8 }
  0x14   : > { %p1056_p12 = pnand %p653_p9, %p197_p11  ;;  %s34_s11 = sadd.s32 1, %s947_s22 }
  0x15   : > { %p1074_p2 = pnand %p736_p1, %p1036_p4  ;;  %s807_s14 = scalar_lea.hbm %s1235_s0, 256 }
  0x16   : > { %s1256_s6 = scalar_select %p1056_p12, 1, 0 }
  0x17   : > { %p723_p13 = pneg %p1056_p12  ;;  %p808_p7 = scmp.ne.s32.totalorder %s1235_s0, %s807_s14 }
  0x18   : > { %s1258_s10 = scalar_select %p1074_p2, 1, 0 }
  0x19   : > { %p1068_p5 = pnand %p723_p13, %p1032_p3  ;;  %p814_p4 = scmp.lt.u32.totalorder %s807_s14, %s1235_s0 }
  0x1b   : > { %p809_p9 = pneg %p1068_p5 }
  0x1d   : > { %p810_p11 = pnand %p809_p9, %p808_p7 }
  0x1f   : > { %p811_p13 = pneg %p810_p11 }
  0x21   : > { %p816_p1 = pnand %p814_p4, %p811_p13 }
  0x23   : > { %819 = shalt.err (!%p816_p1)
}
  0x24   : > { %s820_s25 = scalar_lea.vmem %s1060_s8, 256  ;;  %p828_p6 = scmp.lt.s32.totalorder %s1060_s8, %s1060_s8 }
  0x25   : > { %p821_p0 = scmp.ne.s32.totalorder %s1060_s8, %s820_s25  ;;  %p829_p3 = scmp.lt.s32.totalorder %s820_s25, %s820_s25 }
  0x27   : > { %p823_p10 = pnand %p821_p0, %p809_p9  ;;  %p830_p12 = por %p829_p3, %p828_p6 }
  0x29   : > { %p824_p8 = pneg %p823_p10 }
  0x2b   : > { %p831_p2 = pnand %p830_p12, %p824_p8 }
  0x2d   : > { %834 = shalt.err (!%p831_p2)
}
  0x2e   : > { %s1249_s27 = smov 128   ;;  %s955_s7 = smov 8  }
  0x2f   : > { %726 = dma.hbm_to_vmem [thread:$0]  (!%p1068_p5), %s1235_s0, 256, %s1060_s8, [#allocation4], %s1249_s27, %s1249_s27, %s955_s7  }
  0x30   : > { %p36_p10 = scmp.ge.s32.totalorder %s34_s11, 2  ;;  %s69_s14 = sadd.s32 1, %s939_s20 }
  0x31   : > { %s225_s15 = sand.u32 1, %s939_s20   ;;  %s657_s24 = sshll.u32 %s947_s22, 6 }
  0x32   : > { %s1274_s11 = smov (%p36_p10, %s34_s11), 0  ;;  %s656_s16 = sshll.u32 %s225_s15, 6 }
  0x33   : > { %s65_s17 = ssub.s32 %s947_s22, %s1274_s11  ;;  %s1112_s23 = scalar_lea.hbm %s1236_s1, %s657_s24 }
  0x34   : > { %p67_p3 = scmp.eq.s32.totalorder %s65_s17, 0  ;;  %s229_s8 = scalar_lea.vmem [#allocation6], %s656_s16 }
  0x35   : > { %s238_s7 = sshll.u32 %s229_s8, 4  ;;  %s1119_s13 = scalar_lea.sflag [#allocation7], %s225_s15  ;;  %s1117_s7 = int_to_ptr.vmem [resolvable:$true] %s238_s7 }
  0x36   : > { %s1115_s12 = scalar_select %p67_p3, %s939_s20, %s69_s14  }
  0x37   : > { %s835_s27 = scalar_lea.hbm %s1112_s23, 1024  ;;  %p1259_p8 = scmp.ne.s32.totalorder %s1258_s10, 0 }
  0x38   : > { %p836_p6 = scmp.ne.s32.totalorder %s1112_s23, %s835_s27  ;;  %s840_s25 = scalar_lea.hbm %s1236_s1, 2048 }
  0x39   : > { %p837_p12 = pneg %p1259_p8  ;;  %p841_p2 = scmp.lt.u32.totalorder %s1112_s23, %s1236_s1 }
  0x3a   : > { %p842_p7 = scmp.lt.u32.totalorder %s840_s25, %s835_s27  ;;  %p844_p11 = scmp.lt.u32.totalorder %s835_s27, %s1112_s23 }
  0x3b   : > { %p838_p0 = pnand %p837_p12, %p836_p6 }
  0x3c   : > { %p843_p9 = por %p842_p7, %p841_p2 }
  0x3d   : > { %p839_p5 = pneg %p838_p0 }
  0x3e   : > { %p845_p13 = por %p844_p11, %p843_p9 }
  0x40   : > { %p846_p4 = pnand %p845_p13, %p839_p5 }
  0x42   : > { %849 = shalt.err (!%p846_p4)
}
  0x43   : > { %s850_s14 = scalar_lea.vmem %s1117_s7, 1024  ;;  %s956_s15 = smov [#allocation6]  }
  0x44   : > { %p851_p1 = scmp.ne.s32.totalorder %s1117_s7, %s850_s14  ;;  %s855_s8 = sshll.u32 %s956_s15, 4  ;;  %s856_s8 = int_to_ptr.vmem [resolvable:$false] %s855_s8 }
  0x45   : > { %s857_s17 = scalar_lea.vmem %s856_s8, 2048  ;;  %p858_p6 = scmp.lt.s32.totalorder %s1117_s7, %s856_s8 }
  0x46   : > { %p853_p10 = pnand %p851_p1, %p837_p12  ;;  %p859_p0 = scmp.lt.s32.totalorder %s857_s17, %s850_s14 }
  0x48   : > { %p854_p3 = pneg %p853_p10  ;;  %p860_p2 = por %p859_p0, %p858_p6 }
  0x4a   : > { %p861_p7 = pnand %p860_p2, %p854_p3 }
  0x4c   : > { %864 = shalt.err (!%p861_p7)
}
  0x4d   : > { %s957_s27 = smov 64   ;;  %s958_s24 = smov 4  }
  0x4e   : > { %s1260_s25 = smov 128   ;;  %p1261_p12 = scmp.ne.s32.totalorder %s1256_s6, 0 }
  0x4f   : > { %730 = dma.hbm_to_vmem [thread:$0]  (!%p1259_p8), %s1112_s23, 1024, %s1117_s7, %s1119_s13, %s1260_s25, %s957_s27, %s958_s24  }
  0x50   : > { %268 = sbr.rel (%p1261_p12) target bundleno = 416 (0x1a0), region = 40  ;;  %p1262_p5 = scmp.ne.s32.totalorder (!%p1261_p12), %s1251_s26, 0 }
  0x57   : > { %918 = dma.done.wait (%p1262_p5), [#allocation4], 256  }
  0x58   : > { %920 = vsyncadd (%p1262_p5), [#allocation4], 4294967040  ;;  %s1155_s16 = sand.u32 1, %s935_s19   ;;  %p1263_p9 = scmp.ne.s32.totalorder %s1253_s28, 0 }
  0x59   : > { %s660_s9 = sshll.u32 %s1155_s16, 6  ;;  %s275_s14 = scalar_lea.sflag [#allocation7], %s1155_s16 }
  0x5a   : > { %s278_s10 = scalar_lea.vmem [#allocation6], %s660_s9 }
  0x5b   : > { %922 = dma.done.wait (%p1263_p9), %s275_s14, 1024  }
  0x5c   : > { %924 = vsyncadd (%p1263_p9), %s275_s14, 4294966272  ;;  %v959_v0 = vmov 0.0   ;;  %vm960_vm0 = vmmov 0   ;;  %v797_v1 = vld [vmem:[%s278_s10] sm:$0xff]   ;;  %v798_v2 = vld [vmem:[%s278_s10 + $0x8] sm:$0xff]   ;;  %p315_p8 = scmp.lt.s32.totalorder %s943_s21, 1 }
  0x5d   : > { %695 = vmatprep.subr.bf16.mxu0 %v959_v0  ;;  %711 = vmatprep.mubr.msk.bf16.mxu0 %vm960_vm0, %v959_v0  ;;  %v799_v3 = vld [vmem:[%s278_s10 + $0x10] sm:$0xff]   ;;  %v800_v4 = vld [vmem:[%s278_s10 + $0x18] sm:$0xff]   ;;  %v801_v5 = vld [vmem:[%s278_s10 + $0x20] sm:$0xff]   ;;  %s661_s24 = sshll.u32 %s1155_s16, 3  ;;  %s676_s25 = sshll.u32 %s943_s21, 6 }
  0x5e   : > { %696 = vmatpush3.bf16.msra.mxu0 %v797_v1  ;;  %v802_v6 = vld [vmem:[%s278_s10 + $0x28] sm:$0xff]   ;;  %v803_v7 = vld [vmem:[%s278_s10 + $0x30] sm:$0xff]   ;;  %v804_v8 = vld [vmem:[%s278_s10 + $0x38] sm:$0xff]   ;;  %s1165_s23 = scalar_select %p315_p8, %s943_s21, 1 }
  0x5f   : > { %697 = vmatprep.subr.bf16.mxu0 %v959_v0  ;;  %v333_v9 = vld [vmem:[#allocation3] sm:$0xff]  ;;  %v334_v10 = vld [vmem:[#allocation3 + $0x8] sm:$0xff]  ;;  %s313_s9 = scalar_lea.vmem [#allocation8], %s661_s24  ;;  %s515_s28 = scalar_lea.sflag [#allocation5], %s1155_s16 }
  0x60   : > { %v335_v11 = vpack.c.bf16 %v334_v10, %v333_v9  ;;  %s317_s6 = scalar_lea.vmem %s1237_s2, %s1165_s23  ;;  %s320_s15 = scalar_lea.vmem %s1238_s3, %s1165_s23 }
  0x61   : > { %v670_v13 = vld [vmem:[%s317_s6] ss:$0 sm:$0xff]  ;;  %s323_s27 = scalar_lea.vmem %s1239_s4, %s1165_s23  ;;  %s527_s14 = sshll.u32 %s313_s9, 4  ;;  %s1186_s14 = int_to_ptr.vmem [resolvable:$true] %s527_s14 }
  0x62   : > { %698 = vmatpush3.bf16.msra.mxu0 %v798_v2  ;;  %v671_v41 = vld [vmem:[%s320_s15] ss:$0 sm:$0xff]  ;;  %s1184_s23 = scalar_lea.hbm %s1240_s5, %s676_s25  ;;  %s865_s21 = scalar_lea.vmem %s1186_s14, 128 }
  0x63   : > { %699 = vmatprep.subr.bf16.mxu0 %v959_v0  ;;  %v672_v44 = vld [vmem:[%s323_s27] ss:$0 sm:$0xff]  ;;  %p866_p11 = scmp.ne.s32.totalorder %s1186_s14, %s865_s21  ;;  %p1264_p13 = scmp.ne.s32.totalorder %s1254_s29, 0 }
  0x64   : > { %s961_s6 = smov [#allocation8]  }
  0x65   : > { %p867_p4 = pnand %p866_p11, %p1264_p13  ;;  %s869_s7 = sshll.u32 %s961_s6, 4  ;;  %s870_s7 = int_to_ptr.vmem [resolvable:$false] %s869_s7 }
  0x66   : > { %700 = vmatpush3.bf16.msra.mxu0 %v799_v3  ;;  %s871_s13 = scalar_lea.vmem %s870_s7, 256  ;;  %p872_p10 = scmp.lt.s32.totalorder %s1186_s14, %s870_s7 }
  0x67   : > { %701 = vmatprep.subr.bf16.mxu0 %v959_v0  ;;  %p868_p1 = pneg %p867_p4  ;;  %p873_p3 = scmp.lt.s32.totalorder %s871_s13, %s865_s21 }
  0x69   : > { %p874_p6 = por %p873_p3, %p872_p10 }
  0x6a   : > { %702 = vmatpush3.bf16.msra.mxu0 %v800_v4 }
  0x6b   : > { %703 = vmatprep.subr.bf16.mxu0 %v959_v0  ;;  %p875_p0 = pnand %p874_p6, %p868_p1 }
  0x6e   : > { %704 = vmatpush3.bf16.msra.mxu0 %v801_v5 }
  0x6f   : > { %705 = vmatprep.subr.bf16.mxu0 %v959_v0 }
  0x72   : > { %706 = vmatpush3.bf16.msra.mxu0 %v802_v6 }
  0x73   : > { %707 = vmatprep.subr.bf16.mxu0 %v959_v0 }
  0x76   : > { %708 = vmatpush3.bf16.msra.mxu0 %v803_v7 }
  0x77   : > { %709 = vmatprep.subr.bf16.mxu0 %v959_v0 }
  0x7a   : > { %710 = vmatpush3.bf16.msra.mxu0 %v804_v8 }
  0x7d   : > { %712 = vmatmul.mubr.bf16.vlgmr.msra.gmra.mrb[0].mxu0 %v335_v11 }
 0x150   : > { %v434_v12 = vpop.f32.mrb[0].mxu0 }
 0x151   : > { %v713_v14 = vpop.f32.mrb[1].mxu0  ;;  %v457_v16 = vadd.f32 %v670_v13, %v434_v12 }
 0x152   : > { %v437_v15 = vpop.f32.mrb[2].mxu0 }
 0x153   : > { %v458_v17 = vadd.f32 %v670_v13, %v437_v15  ;;  %v714_v18 = vpop.f32.mrb[3].mxu0 }
 0x155   : > { %v459_v19 = vadd.f32 %v458_v17, %v457_v16 }
 0x157   : > { %v460_v20 = vrot.slane %v459_v19, 4 }
 0x159   : > { %v461_v21 = vadd.f32 %v460_v20, %v459_v19 }
 0x15b   : > { %v462_v22 = vrot.slane %v461_v21, 2 }
 0x15d   : > { %v463_v23 = vadd.f32 %v462_v22, %v461_v21 }
 0x15f   : > { %v464_v24 = vrot.slane %v463_v23, 1 }
 0x161   : > { %v465_v25 = vadd.f32 %v464_v24, %v463_v23 }
 0x163   : > { %v467_v26 = vmul.f32 0.0625, %v465_v25 }
 0x165   : > { %v468_v27 = vsub.f32 %v457_v16, %v467_v26  ;;  %v469_v28 = vsub.f32 %v458_v17, %v467_v26 }
 0x167   : > { %v470_v29 = vmul.f32 %v468_v27, %v468_v27  ;;  %v471_v30 = vmul.f32 %v469_v28, %v469_v28 }
 0x169   : > { %v472_v31 = vadd.f32 %v471_v30, %v470_v29 }
 0x16b   : > { %v473_v32 = vrot.slane %v472_v31, 4 }
 0x16d   : > { %v474_v33 = vadd.f32 %v473_v32, %v472_v31 }
 0x16f   : > { %v475_v34 = vrot.slane %v474_v33, 2 }
 0x171   : > { %v476_v35 = vadd.f32 %v475_v34, %v474_v33 }
 0x173   : > { %v477_v36 = vrot.slane %v476_v35, 1 }
 0x175   : > { %v478_v37 = vadd.f32 %v477_v36, %v476_v35 }
 0x177   : > { %v479_v38 = vmul.f32 0.0625, %v478_v37 }
 0x179   : > { %v480_v39 = vadd.f32 1e-05, %v479_v38 }
 0x17b   : > { %805 = vrsqrt.f32 %v480_v39 }
 0x185   : > { %v806_v40 = vpop.eup %805 }
 0x186   : > { %v482_v42 = vmul.f32 %v806_v40, %v468_v27  ;;  %v483_v43 = vmul.f32 %v806_v40, %v469_v28 }
 0x188   : > { %v491_v45 = vmul.f32 %v671_v41, %v482_v42  ;;  %v492_v46 = vmul.f32 %v671_v41, %v483_v43 }
 0x18a   : > { %v500_v47 = vadd.f32 %v672_v44, %v491_v45  ;;  %v501_v48 = vadd.f32 %v672_v44, %v492_v46 }
 0x18c   : > { %v502_v49 = vmax.f32 %v500_v47, 0.0  ;;  %v503_v50 = vmax.f32 %v501_v48, 0.0 }
 0x18e   : > { %v684_v51 = vpack.c.bf16 %v503_v50, %v502_v49 }
 0x190   : > { %685 = vst [vmem:[%s313_s9] sm:$0xff] %v684_v51  }
 0x191   : > { %878 = shalt.err (!%p875_p0)
}
 0x192   : > { %s879_s15 = scalar_lea.hbm %s1184_s23, 128  ;;  %s883_s27 = scalar_lea.hbm %s1240_s5, 256 }
 0x193   : > { %p880_p2 = scmp.ne.s32.totalorder %s1184_s23, %s879_s15  ;;  %p884_p5 = scmp.lt.u32.totalorder %s1184_s23, %s1240_s5 }
 0x194   : > { %p885_p9 = scmp.lt.u32.totalorder %s883_s27, %s879_s15  ;;  %p887_p11 = scmp.lt.u32.totalorder %s879_s15, %s1184_s23 }
 0x195   : > { %p881_p7 = pnand %p880_p2, %p1264_p13 }
 0x196   : > { %p886_p8 = por %p885_p9, %p884_p5 }
 0x197   : > { %p882_p12 = pneg %p881_p7 }
 0x198   : > { %p888_p4 = por %p887_p11, %p886_p8 }
 0x19a   : > { %p889_p1 = pnand %p888_p4, %p882_p12 }
 0x19c   : > { %892 = shalt.err (!%p889_p1)
}
 0x19d   : > { %s962_s9 = smov 64   ;;  %s963_s10 = smov 128  }
 0x19e   : > { %s964_s26 = smov 4  }
 0x19f   : > { %721 = dma.vmem_to_hbm [thread:$0]  (%p1264_p13), %s1186_s14, 128, %s1184_s23, %s515_s28, %s962_s9, %s963_s10, %s964_s26  }
 0x1a0 PF: > { %s1265_s21 = sld [smem:[#allocation12_spill]]  ;;  %s542_s6 = sand.u32 1, %s931_s18  }
 0x1a1   : > { %p1266_p10 = scmp.ne.s32.totalorder %s1255_s30, 0  ;;  %s543_s7 = scalar_lea.sflag [#allocation5], %s542_s6 }
 0x1a6   : > { %p1267_p3 = scmp.ge.s32.totalorder %s1265_s21, 2 }
 0x1a8   : > { %p732_p6 = pnand %p1267_p3, %p1266_p10 }
 0x1aa   : > { %926 = dma.done.wait (!%p732_p6), %s543_s7, 128  }
 0x1ab   : > { %928 = vsyncadd (!%p732_p6), %s543_s7, 4294967168  ;;  %s22_s23 = sadd.s32 1, %s1265_s21   ;;  %s1268_s18 = smov %s935_s19 }
 0x1ac   : > { %p19_p0 = scmp.ge.s32.totalorder %s22_s23, 4   ;;  %s1269_s19 = smov %s939_s20 }
 0x1ad   : > { %s1270_s20 = smov %s1115_s12  ;;  %s1271_s21 = smov %s947_s22 }
 0x1ae   : > { %s1272_s22 = smov %s1274_s11  ;;  %21 = sbr.rel (!%p19_p0) target bundleno = 7 (0x7), region = 108 }
 0x1b5   :  { %548 = vsyncpa [#allocation4], 1 }
 0x1b6   :  { %550 = vsyncpa [#allocation4 + $0x1], 1 }
 0x1b7   :  { %551 = vsyncpa [#allocation7], 1 }
 0x1b8   :  { %553 = vsyncpa [#allocation7 + $0x1], 1 }
 0x1b9   :  { %554 = vsyncpa [#allocation5], 1 }
 0x1ba   :  { %556 = vsyncpa [#allocation5 + $0x1], 1 }

</bundles_post_ra>
